<compile_context>
chip_gen: v6e
topology: v6e:2x2x1
jax: 0.10.0
libtpu: 0.0.40
codegen_flags: <defaults>
</compile_context>

<pallas_src>
import jax
import jax.numpy as jnp
from jax.experimental import pallas as pl
from jax.experimental.pallas import tpu as pltpu


def _mlp_kernel(x_ref, w1_ref, b1_ref, w2_ref, b2_ref, out_ref):
    # Linear 1: MXU matmul with f32 accumulation; bias-add + ReLU in f32 (VPU).
    h = jnp.dot(x_ref[...], w1_ref[...], preferred_element_type=jnp.float32)
    h = jnp.maximum(h + b1_ref[...], 0.0)
    # Linear 2 into a lane-dense (128-wide, zero-padded) output slab.
    o = jnp.dot(h.astype(w2_ref.dtype), w2_ref[...],
                preferred_element_type=jnp.float32)
    out_ref[...] = (o + b2_ref[...]).astype(out_ref.dtype)


def _round_up(n, m):
    return ((n + m - 1) // m) * m


def net_forward(x, w1, b1, w2, b2, *, compute_dtype=jnp.float32,
                block_batch=512):
    """Forward pass of Net.

    x:  [B, obs_size]
    w1: [obs_size, hidden]   b1: [hidden]
    w2: [hidden, n_actions]  b2: [n_actions]
    Returns f32 [B, n_actions].
    """
    B, obs = x.shape
    hidden, n_actions = w2.shape

    # --- lane-dense output: pad n_actions -> multiple of 128 ----------------
    n_pad = _round_up(max(n_actions, 128), 128)
    w2_p = jnp.zeros((hidden, n_pad), compute_dtype).at[:, :n_actions].set(
        w2.astype(compute_dtype))
    b2_p = jnp.zeros((1, n_pad), jnp.float32).at[:, :n_actions].set(
        b2.astype(jnp.float32))

    w1_c = w1.astype(compute_dtype)
    b1_2d = b1.astype(jnp.float32).reshape(1, hidden)

    # --- batch tiling: big tiles, weights stay resident ---------------------
    tb = min(block_batch, _round_up(B, 8))
    b_pad = _round_up(B, tb)
    x_c = x.astype(compute_dtype)
    if b_pad != B:
        x_c = jnp.zeros((b_pad, obs), compute_dtype).at[:B].set(x_c)
    grid = (b_pad // tb,)

    out = pl.pallas_call(
        _mlp_kernel,
        out_shape=jax.ShapeDtypeStruct((b_pad, n_pad), jnp.float32),
        grid=grid,
        in_specs=[
            # x streams through the pipeline, one batch tile per grid step.
            pl.BlockSpec((tb, obs), lambda i: (i, 0)),
            # Weights / biases: constant block index -> VMEM-resident.
            pl.BlockSpec((obs, hidden), lambda i: (0, 0)),
            pl.BlockSpec((1, hidden), lambda i: (0, 0)),
            pl.BlockSpec((hidden, n_pad), lambda i: (0, 0)),
            pl.BlockSpec((1, n_pad), lambda i: (0, 0)),
        ],
        out_specs=pl.BlockSpec((tb, n_pad), lambda i: (i, 0)),
        compiler_params=pltpu.CompilerParams(
            dimension_semantics=("parallel",)),
    )(x_c, w1_c, b1_2d, w2_p, b2_p)

    return out[:B, :n_actions]


if __name__ == "__main__":
    # FrozenLake-4x4: obs_size=16 (one-hot observation), hidden=128, n_actions=4
    batch, obs_size, hidden_size, n_actions = 80, 16, 128, 4

    key = jax.random.PRNGKey(0)
    k_x, k_w1, k_b1, k_w2, k_b2 = jax.random.split(key, 5)

    # Deterministic synthetic parameters (PyTorch-style uniform fan-in init)
    x = jax.random.normal(k_x, (batch, obs_size), dtype=jnp.float32)
    lim1 = 1.0 / jnp.sqrt(obs_size)
    w1 = jax.random.uniform(k_w1, (obs_size, hidden_size), jnp.float32, -lim1, lim1)
    b1 = jax.random.uniform(k_b1, (hidden_size,), jnp.float32, -lim1, lim1)
    lim2 = 1.0 / jnp.sqrt(hidden_size)
    w2 = jax.random.uniform(k_w2, (hidden_size, n_actions), jnp.float32, -lim2, lim2)
    b2 = jax.random.uniform(k_b2, (n_actions,), jnp.float32, -lim2, lim2)

    ref = jnp.maximum(x @ w1 + b1, 0.0) @ w2 + b2

    # f32 path; small block_batch to exercise multi-tile grid + batch padding.
    out = net_forward(x, w1, b1, w2, b2, block_batch=32)
    jax.block_until_ready(out)
    assert out.shape == (batch, n_actions)
    assert jnp.allclose(out, ref, atol=1e-5, rtol=1e-5)

    # bf16 weights/activations (v6e/v7x MXU-native), f32 accumulate + epilogue.
    out_bf16 = net_forward(x, w1, b1, w2, b2, compute_dtype=jnp.bfloat16)
    jax.block_until_ready(out_bf16)
    assert jnp.allclose(out_bf16, ref, atol=5e-2, rtol=5e-2)

    print("KERNEL_OK")
</pallas_src>

<mosaic_0001>
module attributes {stable_mosaic.version = 11 : i64} {
  func.func @_mlp_kernel(%arg0: i32, %arg1: memref<32x16xf32, #tpu.memory_space<vmem>>, %arg2: memref<16x128xf32, #tpu.memory_space<vmem>>, %arg3: memref<1x128xf32, #tpu.memory_space<vmem>>, %arg4: memref<128x128xf32, #tpu.memory_space<vmem>>, %arg5: memref<1x128xf32, #tpu.memory_space<vmem>>, %arg6: memref<32x128xf32, #tpu.memory_space<vmem>>) attributes {dimension_semantics = [#tpu.dimension_semantics<parallel>], iteration_bounds = array<i64: 3>, scalar_prefetch = 0 : i64, scratch_operands = 0 : i64, tpu.core_type = #tpu.core_type<tc>, window_params = [{transform_indices = @transform_0, window_bounds = array<i64: 32, 16>}, {pipeline_mode = #tpu.pipeline_mode<synchronous>, transform_indices = @transform_1, window_bounds = array<i64: 16, 128>}, {pipeline_mode = #tpu.pipeline_mode<synchronous>, transform_indices = @transform_2, window_bounds = array<i64: 1, 128>}, {pipeline_mode = #tpu.pipeline_mode<synchronous>, transform_indices = @transform_3, window_bounds = array<i64: 128, 128>}, {pipeline_mode = #tpu.pipeline_mode<synchronous>, transform_indices = @transform_4, window_bounds = array<i64: 1, 128>}, {transform_indices = @transform_5, window_bounds = array<i64: 32, 128>}]} {
    %c0 = arith.constant 0 : index
    %c0_0 = arith.constant 0 : index
    %0 = vector.load %arg1[%c0, %c0_0] : memref<32x16xf32, #tpu.memory_space<vmem>>, vector<32x16xf32>
    %c0_1 = arith.constant 0 : index
    %c0_2 = arith.constant 0 : index
    %1 = vector.load %arg2[%c0_1, %c0_2] : memref<16x128xf32, #tpu.memory_space<vmem>>, vector<16x128xf32>
    %cst = arith.constant dense<0.000000e+00> : vector<32x128xf32>
    %2 = tpu.matmul %0, %1, %cst {dimension_numbers = #tpu.dot_dimension_numbers<[1], [0], [0], [1], [0, 0, 1, 1], [], []>} : vector<32x16xf32>, vector<16x128xf32>, vector<32x128xf32> -> vector<32x128xf32>
    %c0_3 = arith.constant 0 : index
    %c0_4 = arith.constant 0 : index
    %3 = vector.load %arg3[%c0_3, %c0_4] : memref<1x128xf32, #tpu.memory_space<vmem>>, vector<1x128xf32>
    %4 = vector.broadcast %3 : vector<1x128xf32> to vector<32x128xf32>
    %5 = arith.addf %2, %4 : vector<32x128xf32>
    %cst_5 = arith.constant 0.000000e+00 : f32
    %6 = vector.broadcast %cst_5 : f32 to vector<32x128xf32>
    %7 = arith.maximumf %5, %6 : vector<32x128xf32>
    %c0_6 = arith.constant 0 : index
    %c0_7 = arith.constant 0 : index
    %8 = vector.load %arg4[%c0_6, %c0_7] : memref<128x128xf32, #tpu.memory_space<vmem>>, vector<128x128xf32>
    %cst_8 = arith.constant dense<0.000000e+00> : vector<32x128xf32>
    %9 = tpu.matmul %7, %8, %cst_8 {dimension_numbers = #tpu.dot_dimension_numbers<[1], [0], [0], [1], [0, 0, 1, 1], [], []>} : vector<32x128xf32>, vector<128x128xf32>, vector<32x128xf32> -> vector<32x128xf32>
    %c0_9 = arith.constant 0 : index
    %c0_10 = arith.constant 0 : index
    %10 = vector.load %arg5[%c0_9, %c0_10] : memref<1x128xf32, #tpu.memory_space<vmem>>, vector<1x128xf32>
    %11 = vector.broadcast %10 : vector<1x128xf32> to vector<32x128xf32>
    %12 = arith.addf %9, %11 : vector<32x128xf32>
    %c0_11 = arith.constant 0 : index
    %c0_12 = arith.constant 0 : index
    %13 = vector.load %arg6[%c0_11, %c0_12] : memref<32x128xf32, #tpu.memory_space<vmem>>, vector<32x128xf32>
    tpu.vector_store %arg6[%c0_11, %c0_12], %12 {strides = array<i32>} : memref<32x128xf32, #tpu.memory_space<vmem>>, vector<32x128xf32>,
    return
  }
  func.func @transform_0(%arg0: i32) -> (i32, i32) {
    %c0_i32 = arith.constant 0 : i32
    %c0_i32_0 = arith.constant 0 : i32
    return %arg0, %c0_i32 : i32, i32
  }
  func.func @transform_1(%arg0: i32) -> (i32, i32) {
    %c0_i32 = arith.constant 0 : i32
    %c0_i32_0 = arith.constant 0 : i32
    %c0_i32_1 = arith.constant 0 : i32
    return %c0_i32, %c0_i32_0 : i32, i32
  }
  func.func @transform_2(%arg0: i32) -> (i32, i32) {
    %c0_i32 = arith.constant 0 : i32
    %c0_i32_0 = arith.constant 0 : i32
    %c0_i32_1 = arith.constant 0 : i32
    return %c0_i32, %c0_i32_0 : i32, i32
  }
  func.func @transform_3(%arg0: i32) -> (i32, i32) {
    %c0_i32 = arith.constant 0 : i32
    %c0_i32_0 = arith.constant 0 : i32
    %c0_i32_1 = arith.constant 0 : i32
    return %c0_i32, %c0_i32_0 : i32, i32
  }
  func.func @transform_4(%arg0: i32) -> (i32, i32) {
    %c0_i32 = arith.constant 0 : i32
    %c0_i32_0 = arith.constant 0 : i32
    %c0_i32_1 = arith.constant 0 : i32
    return %c0_i32, %c0_i32_0 : i32, i32
  }
  func.func @transform_5(%arg0: i32) -> (i32, i32) {
    %c0_i32 = arith.constant 0 : i32
    %c0_i32_0 = arith.constant 0 : i32
    return %arg0, %c0_i32 : i32, i32
  }
}

</mosaic_0001>

<bundles_post_ra>
// kernel: tpu_custom_call.1
= control target key start
LH: loop header
LB: loop body
LE: loop exit
PB: predicated region body
PF: predicated region fallthrough
CT: control target
= control target key end

     0   :  { %10 = vsyncpa [#allocation3], 0  ;;  %s968_s0 = inlined_call_operand.vmem [shape: f32[96,16], index: 0, kind: input, shape index: {}]   ;;  %s969_s1 = inlined_call_operand.vmem [shape: f32[16,128], index: 1, kind: input, shape index: {}]   ;;  %s970_s2 = inlined_call_operand.vmem [shape: f32[1,128], index: 2, kind: input, shape index: {}]   ;;  %s971_s3 = inlined_call_operand.hbm [shape: f32[128,128], index: 3, kind: input, shape index: {}]   ;;  %s972_s4 = inlined_call_operand.vmem [shape: f32[1,128], index: 4, kind: input, shape index: {}]   ;;  %s973_s5 = inlined_call_operand.hbm [shape: f32[96,128], index: 5, kind: output, shape index: {}]  }
   0x1   :  { %11 = vsyncpa [#allocation4], 0 }
   0x2   :  { %13 = vsyncpa [#allocation4 + $0x1], 0  ;;  %s833_s18 = smov 0   ;;  %s835_s19 = smov 0  }
   0x3   :  { %s837_s20 = smov 0   ;;  %s839_s21 = smov 0  }
   0x4 LB: > { %s854_s22 = sadd.s32 4294967295, %s795_s21   ;;  %s556_s23 = sadd.s32 4294967294, %s795_s21   ;;  %s795_s21 = sphi %s839_s21, %s981_s21   ;;  %s791_s20 = sphi %s837_s20, %s980_s20   ;;  %s787_s19 = sphi %s835_s19, %s979_s19   ;;  %s783_s18 = sphi %s833_s18, %s978_s18  }
   0x5   : > { %s858_s24 = sadd.s32 1, %s795_s21   ;;  %s136_s25 = sadd.s32 1, %s791_s20 }
   0x6   : > { %s133_s26 = ssub.s32 %s795_s21, %s858_s24  ;;  %p146_p0 = scmp.ne.s32.totalorder %s791_s20, %s787_s19 }
   0x7   : > { %p134_p1 = scmp.eq.s32.totalorder %s133_s26, 0  ;;  %p147_p2 = scmp.eq.s32.totalorder %s854_s22, 2 }
   0x8   : > { %p152_p3 = scmp.ne.s32.totalorder %s787_s19, %s783_s18  ;;  %p153_p4 = scmp.eq.s32.totalorder %s556_s23, 2 }
   0x9   : > { %s869_s27 = scalar_select %p134_p1, %s791_s20, %s136_s25  }
   0xa   : > { %p871_p5 = por %p147_p2, %p146_p0  ;;  %p875_p6 = por %p153_p4, %p152_p3 }
   0xb   : > { %p557_p7 = scmp.ge.s32.totalorder %s795_s21, 1  ;;  %p160_p8 = scmp.lt.s32.totalorder %s795_s21, 4 }
   0xc   : > { %s975_s29 = scalar_select %p875_p6, 1, 0 }
   0xd   : > { %p665_p9 = scmp.eq.s32.totalorder %s854_s22, 0  ;;  %p882_p10 = pnand %p557_p7, %p160_p8 }
   0xe   : > { %s797_s6 = smov [#allocation2]  }
   0xf   : > { %s178_s7 = sshll.u32 %s797_s6, 4  ;;  %p657_p11 = pneg %p882_p10  ;;  %s179_s7 = int_to_ptr.vmem [resolvable:$true] %s178_s7 }
  0x10   : > { %s716_s8 = scalar_lea.vmem %s179_s7, 2048  ;;  %p724_p3 = scmp.lt.s32.totalorder %s179_s7, %s179_s7 }
  0x11   : > { %p658_p12 = pnand %p665_p9, %p657_p11  ;;  %p717_p0 = scmp.ne.s32.totalorder %s179_s7, %s716_s8 }
  0x12   : > { %p725_p4 = scmp.lt.s32.totalorder %s716_s8, %s716_s8 }
  0x13   : > { %p707_p13 = pneg %p658_p12 }
  0x14   : > { %p726_p6 = por %p725_p4, %p724_p3 }
  0x15   : > { %p719_p1 = pnand %p717_p0, %p707_p13 }
  0x17   : > { %p720_p2 = pneg %p719_p1 }
  0x19   : > { %p727_p7 = pnand %p726_p6, %p720_p2 }
  0x1b   : > { %730 = shalt.err (!%p727_p7)
}
  0x1c   : > { %s798_s9 = smov 128   ;;  %s799_s10 = smov 8  }
  0x1d   : > { %660 = dma.hbm_to_vmem [thread:$0]  (!%p658_p12), %s971_s3, 2048, %s179_s7, [#allocation3], %s798_s9, %s798_s9, %s799_s10  }
  0x1e   : > { %206 = sbr.rel (%p882_p10) target bundleno = 459 (0x1cb), region = 40 }
  0x23   : > { %774 = dma.done.wait (%p665_p9), [#allocation3], 2048  }
  0x24   : > { %776 = vsyncadd (%p665_p9), [#allocation3], 4294965248  ;;  %s563_s13 = sshll.u32 %s854_s22, 2  ;;  %vm254_vm0 = vcmask 130048   ;;  %v246_v0 = vld [vmem:[%s969_s1 + $0x8] sm:$0xff]  ;;  %v245_v1 = vld [vmem:[%s969_s1] sm:$0xff] }
  0x25   : > { %p235_p8 = scmp.lt.s32.totalorder %s563_s13, 11  ;;  %603 = vmatprep.subr.mxu0 %v246_v0  ;;  %v371_v4 = vld [vmem:[#allocation2 + $0x78] sm:$0xff]  ;;  %v370_v5 = vld [vmem:[#allocation2 + $0x70] sm:$0xff]  ;;  %v369_v7 = vld [vmem:[#allocation2 + $0x68] sm:$0xff]  ;;  %s231_s8 = sand.u32 1, %s787_s19  }
  0x26   : > { %604 = vmatpush3.msra.mxu0 %v246_v0  ;;  %613 = vmatprep.subr.mxu1 %v371_v4  ;;  %v368_v9 = vld [vmem:[#allocation2 + $0x60] sm:$0xff]  ;;  %v367_v10 = vld [vmem:[#allocation2 + $0x58] sm:$0xff]  ;;  %v366_v11 = vld [vmem:[#allocation2 + $0x50] sm:$0xff]  ;;  %s562_s9 = sshll.u32 %s231_s8, 5  ;;  %s928_s23 = scalar_lea.sflag [#allocation4], %s231_s8 }
  0x27   : > { %s983_s13 = smov (!%p235_p8, %s563_s13), 11  ;;  %605 = vmatprep.subr.mxu0 %v245_v1  ;;  %614 = vmatpush3.msra.mxu1 %v371_v4  ;;  %v365_v12 = vld [vmem:[#allocation2 + $0x48] sm:$0xff]  ;;  %v364_v13 = vld [vmem:[#allocation2 + $0x40] sm:$0xff]  ;;  %v363_v14 = vld [vmem:[#allocation2 + $0x38] sm:$0xff]  ;;  %s233_s12 = scalar_lea.vmem [#allocation5], %s562_s9 }
  0x28   : > { %s564_s14 = sshll.u32 %s983_s13, 3  ;;  %606 = vmatpush3.msra.mxu0 %v245_v1  ;;  %615 = vmatprep.subr.mxu1 %v370_v5  ;;  %v362_v15 = vld [vmem:[#allocation2 + $0x30] sm:$0xff]  ;;  %v361_v16 = vld [vmem:[#allocation2 + $0x28] sm:$0xff]  ;;  %v360_v17 = vld [vmem:[#allocation2 + $0x20] sm:$0xff]  ;;  %s482_s13 = sshll.u32 %s233_s12, 4  ;;  %s921_s13 = int_to_ptr.vmem [resolvable:$true] %s482_s13 }
  0x29   : > { %s238_s17 = scalar_lea.vmem %s968_s0, %s564_s14  ;;  %616 = vmatpush3.msra.mxu1 %v370_v5  ;;  %v359_v18 = vld [vmem:[#allocation2 + $0x18] sm:$0xff]  ;;  %v358_v19 = vld [vmem:[#allocation2 + $0x10] sm:$0xff]  ;;  %v357_v20 = vld [vmem:[#allocation2 + $0x8] sm:$0xff]  ;;  %s576_s14 = sshll.u32 %s854_s22, 9 }
  0x2a   : > { %v241_v2 = vld [vmem:[%s238_s17] sm:$0xff]  ;;  %v242_v3 = vld [vmem:[%s238_s17 + $0x8] sm:$0xff]  ;;  %v243_v6 = vld [vmem:[%s238_s17 + $0x10] sm:$0xff]  ;;  %617 = vmatprep.subr.mxu1 %v369_v7  ;;  %s731_s22 = scalar_lea.vmem %s921_s13, 512  ;;  %s800_s25 = smov [#allocation5]  }
  0x2b   : > { %607 = vmatprep.mubr.msk.f32.mxu0 %vm254_vm0, %v241_v2  ;;  %v244_v8 = vld [vmem:[%s238_s17 + $0x18] sm:$0xff]  ;;  %618 = vmatpush3.msra.mxu1 %v369_v7  ;;  %v356_v21 = vld [vmem:[#allocation2] sm:$0xff]  ;;  %s926_s17 = scalar_lea.hbm %s973_s5, %s576_s14  ;;  %p732_p6 = scmp.ne.s32.totalorder %s921_s13, %s731_s22 }
  0x2c   : > { %608 = vmatmul.mubr.msk.f32.vlgmr.msra.gmra.mxu0 %vm254_vm0, %v242_v3  ;;  %619 = vmatprep.subr.mxu1 %v368_v9  ;;  %v565_v22 = vld [vmem:[%s970_s2] ss:$0 sm:$0xff]  ;;  %s735_s26 = sshll.u32 %s800_s25, 4  ;;  %s736_s26 = int_to_ptr.vmem [resolvable:$false] %s735_s26 }
  0x2d   : > { %610 = vmatprep.mubr.msk.f32.mxu0 %vm254_vm0, %v243_v6  ;;  %620 = vmatpush3.msra.mxu1 %v368_v9  ;;  %v570_v35 = vld [vmem:[%s972_s4] ss:$0 sm:$0xff]  ;;  %p733_p9 = pnand %p732_p6, %p871_p5  ;;  %s737_s30 = scalar_lea.vmem %s736_s26, 1024 }
  0x2e   : > { %621 = vmatprep.subr.mxu1 %v367_v10  ;;  %p738_p11 = scmp.lt.s32.totalorder %s921_s13, %s736_s26  ;;  %p739_p12 = scmp.lt.s32.totalorder %s737_s30, %s731_s22 }
  0x2f   : > { %622 = vmatpush3.msra.mxu1 %v367_v10  ;;  %p734_p10 = pneg %p733_p9 }
  0x30   : > { %611 = vmatmul.mubr.msk.f32.gmra.mxu0 %vm254_vm0, %v244_v8  ;;  %623 = vmatprep.subr.mxu1 %v366_v11  ;;  %p740_p13 = por %p739_p12, %p738_p11 }
  0x31   : > { %624 = vmatpush3.msra.mxu1 %v366_v11 }
  0x32   : > { %625 = vmatprep.subr.mxu1 %v365_v12  ;;  %p741_p0 = pnand %p740_p13, %p734_p10 }
  0x33   : > { %626 = vmatpush3.msra.mxu1 %v365_v12 }
  0x34   : > { %627 = vmatprep.subr.mxu1 %v364_v13 }
  0x35   : > { %628 = vmatpush3.msra.mxu1 %v364_v13 }
  0x36   : > { %629 = vmatprep.subr.mxu1 %v363_v14 }
  0x37   : > { %630 = vmatpush3.msra.mxu1 %v363_v14 }
  0x38   : > { %631 = vmatprep.subr.mxu1 %v362_v15 }
  0x39   : > { %632 = vmatpush3.msra.mxu1 %v362_v15 }
  0x3a   : > { %633 = vmatprep.subr.mxu1 %v361_v16 }
  0x3b   : > { %634 = vmatpush3.msra.mxu1 %v361_v16 }
  0x3c   : > { %635 = vmatprep.subr.mxu1 %v360_v17 }
  0x3d   : > { %636 = vmatpush3.msra.mxu1 %v360_v17 }
  0x3e   : > { %637 = vmatprep.subr.mxu1 %v359_v18 }
  0x3f   : > { %638 = vmatpush3.msra.mxu1 %v359_v18 }
  0x40   : > { %639 = vmatprep.subr.mxu1 %v358_v19 }
  0x41   : > { %640 = vmatpush3.msra.mxu1 %v358_v19 }
  0x42   : > { %641 = vmatprep.subr.mxu1 %v357_v20 }
  0x43   : > { %642 = vmatpush3.msra.mxu1 %v357_v20 }
  0x44   : > { %643 = vmatprep.subr.mxu1 %v356_v21 }
  0x45   : > { %644 = vmatpush3.msra.mxu1 %v356_v21 }
  0xec   : > { %v609_v23 = vpop.f32.mrf.mxu0 }
  0xed   : > { %v339_v24 = vadd.f32 %v609_v23, %v565_v22 }
  0xee   : > { %v333_v25 = vpop.f32.mrf.mxu0 }
  0xef   : > { %v334_v26 = vadd.f32 %v565_v22, %v333_v25  ;;  %v353_v29 = vmax.f32 %v339_v24, 0.0 }
  0xf0   : > { %v612_v27 = vpop.f32.mrf.mxu0 }
  0xf1   : > { %v352_v28 = vmax.f32 %v334_v26, 0.0  ;;  %v349_v30 = vadd.f32 %v612_v27, %v565_v22 }
  0xf2   : > { %v343_v31 = vpop.f32.mrf.mxu0 }
  0xf3   : > { %v344_v32 = vadd.f32 %v565_v22, %v343_v31  ;;  %645 = vmatprep.mubr.f32.mxu1 %v352_v28  ;;  %v355_v34 = vmax.f32 %v349_v30, 0.0 }
  0xf4   : > { %646 = vmatmul.mubr.f32.vlgmr.msra.gmra.mxu1 %v353_v29 }
  0xf5   : > { %v354_v33 = vmax.f32 %v344_v32, 0.0 }
  0xf7   : > { %648 = vmatprep.mubr.f32.mxu1 %v354_v33 }
  0xf8   : > { %649 = vmatmul.mubr.f32.gmra.mxu1 %v355_v34 }
 0x1b4   : > { %v647_v36 = vpop.f32.mrf.mxu1 }
 0x1b5   : > { %v451_v37 = vadd.f32 %v647_v36, %v570_v35 }
 0x1b6   : > { %v445_v38 = vpop.f32.mrf.mxu1 }
 0x1b7   : > { %465 = vst [vmem:[%s233_s12 + $0x8] sm:$0xff] %v451_v37  ;;  %v446_v39 = vadd.f32 %v570_v35, %v445_v38 }
 0x1b8   : > { %v650_v40 = vpop.f32.mrf.mxu1 }
 0x1b9   : > { %464 = vst [vmem:[%s233_s12] sm:$0xff] %v446_v39  ;;  %v461_v41 = vadd.f32 %v650_v40, %v570_v35 }
 0x1ba   : > { %v455_v42 = vpop.f32.mrf.mxu1 }
 0x1bb   : > { %467 = vst [vmem:[%s233_s12 + $0x18] sm:$0xff] %v461_v41  ;;  %v456_v43 = vadd.f32 %v570_v35, %v455_v42 }
 0x1bd   : > { %466 = vst [vmem:[%s233_s12 + $0x10] sm:$0xff] %v456_v43 }
 0x1be   : > { %744 = shalt.err (!%p741_p0)
}
 0x1bf   : > { %s745_s6 = scalar_lea.hbm %s926_s17, 512  ;;  %s749_s9 = scalar_lea.hbm %s973_s5, 1536 }
 0x1c0   : > { %p746_p1 = scmp.ne.s32.totalorder %s926_s17, %s745_s6  ;;  %p750_p4 = scmp.lt.s32.totalorder %s926_s17, %s973_s5 }
 0x1c1   : > { %p751_p7 = scmp.lt.s32.totalorder %s749_s9, %s745_s6 }
 0x1c2   : > { %p747_p2 = pnand %p746_p1, %p871_p5 }
 0x1c3   : > { %p752_p8 = por %p751_p7, %p750_p4 }
 0x1c4   : > { %p748_p3 = pneg %p747_p2 }
 0x1c6   : > { %p753_p6 = pnand %p752_p8, %p748_p3 }
 0x1c8   : > { %756 = shalt.err (!%p753_p6)
}
 0x1c9   : > { %s801_s12 = smov 128   ;;  %s802_s14 = smov 8  }
 0x1ca   : > { %655 = dma.vmem_to_hbm [thread:$0]  (%p871_p5), %s921_s13, 512, %s926_s17, %s928_s23, %s801_s12, %s801_s12, %s802_s14  }
 0x1cb PF: > { %p667_p9 = scmp.ge.s32.totalorder %s795_s21, 2  ;;  %s497_s15 = sand.u32 1, %s783_s18  }
 0x1cc   : > { %p977_p10 = scmp.ne.s32.totalorder %s975_s29, 0  ;;  %s498_s16 = scalar_lea.sflag [#allocation4], %s497_s15 }
 0x1ce   : > { %p662_p11 = pnand %p667_p9, %p977_p10 }
 0x1d0   : > { %p663_p12 = pneg %p662_p11 }
 0x1d2   : > { %778 = dma.done.wait (%p663_p12), %s498_s16, 512  }
 0x1d3   : > { %780 = vsyncadd (%p663_p12), %s498_s16, 4294966784  ;;  %p16_p13 = scmp.ge.s32.totalorder %s858_s24, 5   ;;  %s978_s18 = smov %s787_s19 }
 0x1d4   : > { %s979_s19 = smov %s791_s20  ;;  %s980_s20 = smov %s869_s27 }
 0x1d5   : > { %s981_s21 = smov %s858_s24  ;;  %18 = sbr.rel (!%p16_p13) target bundleno = 4 (0x4), region = 80 }
 0x1da   :  { %503 = vsyncpa [#allocation3], 1 }
 0x1db   :  { %505 = vsyncpa [#allocation3 + $0x1], 1 }
 0x1dc   :  { %506 = vsyncpa [#allocation4], 1 }
 0x1dd   :  { %508 = vsyncpa [#allocation4 + $0x1], 1 }

</bundles_post_ra>
